<compile_context>
chip_gen: v7x
topology: tpu7x:2x2x1
jax: 0.10.0
libtpu: 0.0.40
codegen_flags: <defaults>
</compile_context>

<pallas_src>
import math

import jax
import jax.numpy as jnp
from jax.experimental import pallas as pl
from jax.experimental.pallas import tpu as pltpu

_LANE = 128
_SUBLANE = 8
_VPU_MAX_CIN = 16              # <= this many input channels -> skip the MXU
_TARGET_STEP_BYTES = 2 << 20   # streamed activation bytes (x + out) per step
_MAX_UNROLLED_MACS = 256       # bound on bn * C_in for the unrolled VPU path
_MAX_MXU_BN = 32               # bound on per-step unrolled MXU matmuls


def _round_up(x, m):
    return ((x + m - 1) // m) * m


def _vmem_capacity_bytes():
    try:
        return int(pltpu.get_tpu_info().vmem_capacity_bytes)
    except Exception:
        return 64 << 20  # assume the smallest generation (v7x) if query fails


def _choose_blocking(n, hw, per_col, bn_unit, max_bn, stream_budget):
    """Pick (bn, tile): images per grid step and H*W columns per grid step.

    per_col : streamed bytes per H*W column per image (input + output).
    bn_unit : granularity of bn (keeps packed 2-D blocks sublane-full).
    max_bn  : cap on images per step (bounds kernel unrolling).

    Sized by BYTES per step so the ~0.35us per-grid-step pipeline overhead is
    amortized; double-buffered streams stay within stream_budget.
    """
    bn = min(n, bn_unit)
    budget_cols = max(_LANE, stream_budget // (2 * per_col))   # cap on bn*tile
    goal_cols = max(_LANE, min(_TARGET_STEP_BYTES // per_col, budget_cols))

    if bn * hw > goal_cols:
        # Tiling the H*W axis alone reaches the per-step byte goal.
        tile = max(_LANE, (goal_cols // (bn * _LANE)) * _LANE)
        tile = min(tile, hw)            # full extent is always a legal block
        return bn, tile

    # One (bn-packed) image falls below the goal: keep tile = HW, pack images.
    tile = hw
    want_bn = min(n, max_bn, max(bn, goal_cols // max(hw, 1)))
    if want_bn < n:
        # keep bn a multiple of bn_unit (blocks stay sublane-full / legal)
        want_bn = max((want_bn // bn_unit) * bn_unit, bn)
    return want_bn, tile


def _ensure_min_steps(n, hw, bn, tile, bn_unit):
    """Make sure the grid has >= 2 steps so v7x's 2 TensorCores both get work
    (both grid axes are 'parallel'); harmless on single-core v5e/v6e."""
    steps = (-(-n // bn)) * (-(-hw // tile))
    if steps >= 2:
        return bn, tile
    if hw >= 2 * _LANE:
        return bn, _round_up(-(-hw // 2), _LANE)   # split the H*W axis
    if n > 1:
        half = _round_up(-(-n // 2), bn_unit)      # split the batch axis
        if half < n:
            return half, tile
    return bn, tile   # problem too small to split usefully


def _make_vpu_kernel(bn, c_in, c_out):
    """Packed 2-D VPU path: x_ref (bn*C_in, T), o_ref (bn*C_out, T)."""

    def kernel(x_ref, w_ref, b_ref, o_ref):
        x = x_ref[...].astype(jnp.float32)          # (bn*C_in, T)
        w = w_ref[...].astype(jnp.float32)          # (C_out, C_in)
        b = b_ref[...]                              # (C_out, 1) f32
        for img in range(bn):
            r = img * c_in
            # Bias folded into the first MAC (saves a full VALU pass).
            acc = w[:, 0:1] * x[r:r + 1, :] + b
            for k in range(1, c_in):
                acc = acc + w[:, k:k + 1] * x[r + k:r + k + 1, :]
            o_ref[img * c_out:(img + 1) * c_out, :] = acc.astype(o_ref.dtype)

    return kernel


def _make_mxu_kernel(bn):
    """3-D MXU path: x_ref (bn, C_in, T), o_ref (bn, C_out, T)."""

    def kernel(x_ref, w_ref, b_ref, o_ref):
        w = w_ref[...]                              # (C_out, C_in)
        b = b_ref[...]                              # (C_out, 1) f32
        for img in range(bn):
            acc = jnp.dot(w, x_ref[img], preferred_element_type=jnp.float32)
            o_ref[img] = (acc + b).astype(o_ref.dtype)

    return kernel


def out_conv2d(x_nchw, weight, bias):
    """1x1 Conv2d forward, matching nn.Conv2d(in_ch, out_ch, 1).

    x_nchw: (N, C_in, H, W)
    weight: (C_out, C_in, 1, 1)   (PyTorch layout)
    bias:   (C_out,)
    returns (N, C_out, H, W) with x_nchw.dtype
    """
    N, C_in, H, W = x_nchw.shape
    C_out = weight.shape[0]
    HW = H * W
    out_dtype = x_nchw.dtype

    # Free (metadata-only) reshapes.  Weight is matched to the activation
    # dtype so bf16 activations get a native bf16xbf16->f32 MXU pass.
    w_mat = weight.reshape(C_out, C_in)
    if w_mat.dtype != x_nchw.dtype:
        w_mat = w_mat.astype(x_nchw.dtype)
    b_col = bias.reshape(C_out, 1).astype(jnp.float32)

    x_bytes = jnp.dtype(x_nchw.dtype).itemsize
    o_bytes = jnp.dtype(out_dtype).itemsize
    w_bytes = jnp.dtype(w_mat.dtype).itemsize
    per_col = C_in * x_bytes + C_out * o_bytes

    vmem_cap = _vmem_capacity_bytes()
    # v5e/v6e: 128 MiB VMEM per core -> 48 MiB of streams; v7x: 64 MiB -> 24.
    stream_budget = (48 << 20) if vmem_cap >= (96 << 20) else (24 << 20)

    use_mxu = C_in > _VPU_MAX_CIN
    if use_mxu:
        bn_unit = 1
        max_bn = _MAX_MXU_BN
    else:
        # bn granularity that keeps (bn*C_in, T) / (bn*C_out, T) blocks
        # sublane-full (row counts that are multiples of 8).
        bn_unit = math.lcm(8 // math.gcd(C_in, 8), 8 // math.gcd(C_out, 8))
        max_bn = max(bn_unit,
                     ((_MAX_UNROLLED_MACS // C_in) // bn_unit) * bn_unit)

    bn, tile = _choose_blocking(N, HW, per_col, bn_unit, max_bn, stream_budget)
    bn, tile = _ensure_min_steps(N, HW, bn, tile, bn_unit)
    grid = (-(-N // bn), -(-HW // tile))

    # Actual per-step VMEM footprint: double-buffered activation streams plus
    # the single-buffered resident weight/bias (layout-padded).
    tile_pad = _round_up(tile, _LANE)
    if use_mxu:
        x_blk = bn * _round_up(C_in, _SUBLANE) * tile_pad * x_bytes
        o_blk = bn * _round_up(C_out, _SUBLANE) * tile_pad * o_bytes
    else:
        x_blk = _round_up(bn * C_in, _SUBLANE) * tile_pad * x_bytes
        o_blk = _round_up(bn * C_out, _SUBLANE) * tile_pad * o_bytes
    w_res = _round_up(C_out, _SUBLANE) * _round_up(C_in, _LANE) * w_bytes
    b_res = _round_up(C_out, _SUBLANE) * _LANE * 4
    vmem_need = 2 * (x_blk + o_blk) + w_res + b_res
    vmem_limit = int(min(max(vmem_need + (4 << 20), 16 << 20),
                         (vmem_cap * 3) // 4))

    cost = pl.CostEstimate(
        flops=2 * N * HW * C_in * C_out,
        transcendentals=0,
        bytes_accessed=(N * C_in * HW * x_bytes + N * C_out * HW * o_bytes
                        + C_out * C_in * w_bytes + C_out * 4),
    )

    if use_mxu:
        kernel = _make_mxu_kernel(bn)
        x_arr = x_nchw.reshape(N, C_in, HW)
        in_specs = [
            pl.BlockSpec((bn, C_in, tile), lambda n, j: (n, 0, j)),
            pl.BlockSpec((C_out, C_in), lambda n, j: (0, 0)),   # resident
            pl.BlockSpec((C_out, 1), lambda n, j: (0, 0)),      # resident
        ]
        out_specs = pl.BlockSpec((bn, C_out, tile), lambda n, j: (n, 0, j))
        out_shape = jax.ShapeDtypeStruct((N, C_out, HW), out_dtype)
    else:
        kernel = _make_vpu_kernel(bn, C_in, C_out)
        x_arr = x_nchw.reshape(N * C_in, HW)                    # free reshape
        in_specs = [
            pl.BlockSpec((bn * C_in, tile), lambda n, j: (n, j)),
            pl.BlockSpec((C_out, C_in), lambda n, j: (0, 0)),   # resident
            pl.BlockSpec((C_out, 1), lambda n, j: (0, 0)),      # resident
        ]
        out_specs = pl.BlockSpec((bn * C_out, tile), lambda n, j: (n, j))
        out_shape = jax.ShapeDtypeStruct((N * C_out, HW), out_dtype)

    out = pl.pallas_call(
        kernel,
        out_shape=out_shape,
        grid_spec=pltpu.PrefetchScalarGridSpec(
            num_scalar_prefetch=0,
            grid=grid,
            in_specs=in_specs,
            out_specs=out_specs,
        ),
        compiler_params=pltpu.CompilerParams(
            dimension_semantics=("parallel", "parallel"),
            vmem_limit_bytes=vmem_limit,
        ),
        cost_estimate=cost,
    )(x_arr, w_mat, b_col)

    return out.reshape(N, C_out, H, W)


def init_params(key, in_channels, out_channels):
    # Deterministic synthetic init mimicking nn.Conv2d default (uniform bound).
    kw, kb = jax.random.split(key)
    fan_in = in_channels * 1 * 1
    bound = 1.0 / (fan_in ** 0.5)
    weight = jax.random.uniform(
        kw, (out_channels, in_channels, 1, 1), jnp.float32, -bound, bound)
    bias = jax.random.uniform(
        kb, (out_channels,), jnp.float32, -bound, bound)
    return weight, bias


def _reference(x, weight, bias):
    c_out, c_in = weight.shape[0], weight.shape[1]
    return (jnp.einsum("nchw,oc->nohw", x, weight.reshape(c_out, c_in),
                       precision=jax.lax.Precision.HIGHEST)
            + bias.reshape(1, c_out, 1, 1))


if __name__ == "__main__":
    key = jax.random.PRNGKey(0)
    kx1, kp1, kx2, kp2 = jax.random.split(key, 4)

    # --- Small-channel head (VPU sublane-packed path) ---
    N, C_in, H, W = 2, 4, 16, 16
    C_out = 8
    x = jax.random.normal(kx1, (N, C_in, H, W), jnp.float32)
    weight, bias = init_params(kp1, C_in, C_out)

    y = out_conv2d(x, weight, bias)
    jax.block_until_ready(y)
    y_ref = _reference(x, weight, bias)
    assert y.shape == (N, C_out, H, W)
    assert jnp.allclose(y, y_ref, atol=1e-5, rtol=1e-5)

    # --- Moderate-channel case (MXU path), still small shapes ---
    N2, C_in2, H2, W2 = 2, 32, 8, 8
    C_out2 = 16
    x2 = jax.random.normal(kx2, (N2, C_in2, H2, W2), jnp.float32)
    weight2, bias2 = init_params(kp2, C_in2, C_out2)

    y2 = out_conv2d(x2, weight2, bias2)
    jax.block_until_ready(y2)
    y2_ref = _reference(x2, weight2, bias2)
    assert y2.shape == (N2, C_out2, H2, W2)
    assert jnp.allclose(y2, y2_ref, atol=1e-2, rtol=1e-2)

    print("KERNEL_OK")
</pallas_src>

<mosaic_0001>
module attributes {stable_mosaic.version = 11 : i64} {
  func.func @kernel(%arg0: i32, %arg1: i32, %arg2: memref<8x128xf32, #tpu.memory_space<vmem>>, %arg3: memref<8x4xf32, #tpu.memory_space<vmem>>, %arg4: memref<8x1xf32, #tpu.memory_space<vmem>>, %arg5: memref<16x128xf32, #tpu.memory_space<vmem>>) attributes {dimension_semantics = [#tpu.dimension_semantics<parallel>, #tpu.dimension_semantics<parallel>], iteration_bounds = array<i64: 1, 2>, scalar_prefetch = 0 : i64, scratch_operands = 0 : i64, tpu.core_type = #tpu.core_type<tc>, window_params = [{transform_indices = @transform_0, window_bounds = array<i64: 8, 128>}, {pipeline_mode = #tpu.pipeline_mode<synchronous>, transform_indices = @transform_1, window_bounds = array<i64: 8, 4>}, {pipeline_mode = #tpu.pipeline_mode<synchronous>, transform_indices = @transform_2, window_bounds = array<i64: 8, 1>}, {transform_indices = @transform_3, window_bounds = array<i64: 16, 128>}]} {
    %c0 = arith.constant 0 : index
    %c0_0 = arith.constant 0 : index
    %0 = vector.load %arg2[%c0, %c0_0] : memref<8x128xf32, #tpu.memory_space<vmem>>, vector<8x128xf32>
    %c0_1 = arith.constant 0 : index
    %c0_2 = arith.constant 0 : index
    %1 = vector.load %arg3[%c0_1, %c0_2] : memref<8x4xf32, #tpu.memory_space<vmem>>, vector<8x4xf32>
    %c0_3 = arith.constant 0 : index
    %c0_4 = arith.constant 0 : index
    %2 = vector.load %arg4[%c0_3, %c0_4] : memref<8x1xf32, #tpu.memory_space<vmem>>, vector<8x1xf32>
    %3 = vector.extract_strided_slice %1 {offsets = [0, 0], sizes = [8, 1], strides = [1, 1]} : vector<8x4xf32> to vector<8x1xf32>
    %4 = vector.extract_strided_slice %0 {offsets = [0, 0], sizes = [1, 128], strides = [1, 1]} : vector<8x128xf32> to vector<1x128xf32>
    %5 = vector.broadcast %3 : vector<8x1xf32> to vector<8x128xf32>
    %6 = vector.broadcast %4 : vector<1x128xf32> to vector<8x128xf32>
    %7 = arith.mulf %5, %6 : vector<8x128xf32>
    %8 = vector.broadcast %2 : vector<8x1xf32> to vector<8x128xf32>
    %9 = arith.addf %7, %8 : vector<8x128xf32>
    %10 = vector.extract_strided_slice %1 {offsets = [0, 1], sizes = [8, 1], strides = [1, 1]} : vector<8x4xf32> to vector<8x1xf32>
    %11 = vector.extract_strided_slice %0 {offsets = [1, 0], sizes = [1, 128], strides = [1, 1]} : vector<8x128xf32> to vector<1x128xf32>
    %12 = vector.broadcast %10 : vector<8x1xf32> to vector<8x128xf32>
    %13 = vector.broadcast %11 : vector<1x128xf32> to vector<8x128xf32>
    %14 = arith.mulf %12, %13 : vector<8x128xf32>
    %15 = arith.addf %9, %14 : vector<8x128xf32>
    %16 = vector.extract_strided_slice %1 {offsets = [0, 2], sizes = [8, 1], strides = [1, 1]} : vector<8x4xf32> to vector<8x1xf32>
    %17 = vector.extract_strided_slice %0 {offsets = [2, 0], sizes = [1, 128], strides = [1, 1]} : vector<8x128xf32> to vector<1x128xf32>
    %18 = vector.broadcast %16 : vector<8x1xf32> to vector<8x128xf32>
    %19 = vector.broadcast %17 : vector<1x128xf32> to vector<8x128xf32>
    %20 = arith.mulf %18, %19 : vector<8x128xf32>
    %21 = arith.addf %15, %20 : vector<8x128xf32>
    %22 = vector.extract_strided_slice %1 {offsets = [0, 3], sizes = [8, 1], strides = [1, 1]} : vector<8x4xf32> to vector<8x1xf32>
    %23 = vector.extract_strided_slice %0 {offsets = [3, 0], sizes = [1, 128], strides = [1, 1]} : vector<8x128xf32> to vector<1x128xf32>
    %24 = vector.broadcast %22 : vector<8x1xf32> to vector<8x128xf32>
    %25 = vector.broadcast %23 : vector<1x128xf32> to vector<8x128xf32>
    %26 = arith.mulf %24, %25 : vector<8x128xf32>
    %27 = arith.addf %21, %26 : vector<8x128xf32>
    %c0_5 = arith.constant 0 : index
    %c0_6 = arith.constant 0 : index
    %28 = vector.load %arg5[%c0_5, %c0_6] : memref<16x128xf32, #tpu.memory_space<vmem>>, vector<8x128xf32>
    tpu.vector_store %arg5[%c0_5, %c0_6], %27 {strides = array<i32>} : memref<16x128xf32, #tpu.memory_space<vmem>>, vector<8x128xf32>,
    %29 = vector.extract_strided_slice %1 {offsets = [0, 0], sizes = [8, 1], strides = [1, 1]} : vector<8x4xf32> to vector<8x1xf32>
    %30 = vector.extract_strided_slice %0 {offsets = [4, 0], sizes = [1, 128], strides = [1, 1]} : vector<8x128xf32> to vector<1x128xf32>
    %31 = vector.broadcast %29 : vector<8x1xf32> to vector<8x128xf32>
    %32 = vector.broadcast %30 : vector<1x128xf32> to vector<8x128xf32>
    %33 = arith.mulf %31, %32 : vector<8x128xf32>
    %34 = vector.broadcast %2 : vector<8x1xf32> to vector<8x128xf32>
    %35 = arith.addf %33, %34 : vector<8x128xf32>
    %36 = vector.extract_strided_slice %1 {offsets = [0, 1], sizes = [8, 1], strides = [1, 1]} : vector<8x4xf32> to vector<8x1xf32>
    %37 = vector.extract_strided_slice %0 {offsets = [5, 0], sizes = [1, 128], strides = [1, 1]} : vector<8x128xf32> to vector<1x128xf32>
    %38 = vector.broadcast %36 : vector<8x1xf32> to vector<8x128xf32>
    %39 = vector.broadcast %37 : vector<1x128xf32> to vector<8x128xf32>
    %40 = arith.mulf %38, %39 : vector<8x128xf32>
    %41 = arith.addf %35, %40 : vector<8x128xf32>
    %42 = vector.extract_strided_slice %1 {offsets = [0, 2], sizes = [8, 1], strides = [1, 1]} : vector<8x4xf32> to vector<8x1xf32>
    %43 = vector.extract_strided_slice %0 {offsets = [6, 0], sizes = [1, 128], strides = [1, 1]} : vector<8x128xf32> to vector<1x128xf32>
    %44 = vector.broadcast %42 : vector<8x1xf32> to vector<8x128xf32>
    %45 = vector.broadcast %43 : vector<1x128xf32> to vector<8x128xf32>
    %46 = arith.mulf %44, %45 : vector<8x128xf32>
    %47 = arith.addf %41, %46 : vector<8x128xf32>
    %48 = vector.extract_strided_slice %1 {offsets = [0, 3], sizes = [8, 1], strides = [1, 1]} : vector<8x4xf32> to vector<8x1xf32>
    %49 = vector.extract_strided_slice %0 {offsets = [7, 0], sizes = [1, 128], strides = [1, 1]} : vector<8x128xf32> to vector<1x128xf32>
    %50 = vector.broadcast %48 : vector<8x1xf32> to vector<8x128xf32>
    %51 = vector.broadcast %49 : vector<1x128xf32> to vector<8x128xf32>
    %52 = arith.mulf %50, %51 : vector<8x128xf32>
    %53 = arith.addf %47, %52 : vector<8x128xf32>
    %c8 = arith.constant 8 : index
    %c0_7 = arith.constant 0 : index
    %54 = vector.load %arg5[%c8, %c0_7] : memref<16x128xf32, #tpu.memory_space<vmem>>, vector<8x128xf32>
    tpu.vector_store %arg5[%c8, %c0_7], %53 {strides = array<i32>} : memref<16x128xf32, #tpu.memory_space<vmem>>, vector<8x128xf32>,
    return
  }
  func.func @transform_0(%arg0: i32, %arg1: i32) -> (i32, i32) {
    %c0_i32 = arith.constant 0 : i32
    return %arg0, %arg1 : i32, i32
  }
  func.func @transform_1(%arg0: i32, %arg1: i32) -> (i32, i32) {
    %c0_i32 = arith.constant 0 : i32
    %c0_i32_0 = arith.constant 0 : i32
    %c0_i32_1 = arith.constant 0 : i32
    return %c0_i32, %c0_i32_0 : i32, i32
  }
  func.func @transform_2(%arg0: i32, %arg1: i32) -> (i32, i32) {
    %c0_i32 = arith.constant 0 : i32
    %c0_i32_0 = arith.constant 0 : i32
    %c0_i32_1 = arith.constant 0 : i32
    return %c0_i32, %c0_i32_0 : i32, i32
  }
  func.func @transform_3(%arg0: i32, %arg1: i32) -> (i32, i32) {
    %c0_i32 = arith.constant 0 : i32
    return %arg0, %arg1 : i32, i32
  }
}

</mosaic_0001>

<bundles_post_ra>
// kernel: tpu_custom_call.1
= control target key start
LH: loop header
LB: loop body
LE: loop exit
PB: predicated region body
PF: predicated region fallthrough
CT: control target
= control target key end

     0   :  { %8 = vsyncpa [#allocation3], 0  ;;  %s674_s0 = inlined_call_operand.vmem [shape: f32[8,256], index: 0, kind: input, shape index: {}]   ;;  %s675_s1 = inlined_call_operand.vmem [shape: f32[8,4], index: 1, kind: input, shape index: {}]   ;;  %s676_s2 = inlined_call_operand.vmem [shape: f32[8,1], index: 2, kind: input, shape index: {}]   ;;  %s677_s3 = inlined_call_operand.hbm [shape: f32[16,256], index: 3, kind: output, shape index: {}]  }
   0x1   :  { %10 = vsyncpa [#allocation3 + $0x1], 0  ;;  %s549_s12 = smov 0   ;;  %s551_s13 = smov 0  }
   0x2   :  { %s553_s14 = smov 0   ;;  %s555_s15 = smov 0  }
   0x3   :  { %s557_s16 = smov 0   ;;  %s559_s17 = smov 0  }
   0x4 LB: > { %s364_s18 = sadd.s32 4294967295, %s519_s17   ;;  %s365_s19 = sadd.s32 4294967294, %s519_s17   ;;  %s519_s17 = sphi %s559_s17, %s16_s17   ;;  %s515_s16 = sphi %s557_s16, %s684_s16   ;;  %s511_s15 = sphi %s555_s15, %s683_s15   ;;  %s507_s14 = sphi %s553_s14, %s682_s14   ;;  %s503_s13 = sphi %s551_s13, %s681_s13   ;;  %s499_s12 = sphi %s549_s12, %s680_s12  }
   0x5   : > { %s25_s20 = sadd.s32 1, %s515_s16  ;;  %s107_s21 = sadd.s32 1, %s507_s14 }
   0x6   : > { %p26_p0 = scmp.ge.s32.totalorder %s25_s20, 2  ;;  %p117_p1 = scmp.ne.s32.totalorder %s507_s14, %s503_s13 }
   0x7   : > { %p118_p2 = scmp.eq.s32.totalorder %s364_s18, 1  ;;  %p123_p3 = scmp.ne.s32.totalorder %s503_s13, %s499_s12 }
   0x8   : > { %s686_s20 = smov (%p26_p0, %s25_s20), 0  ;;  %p124_p5 = scmp.eq.s32.totalorder %s365_s19, 1 }
   0x9   : > { %p589_p4 = por %p118_p2, %p117_p1  ;;  %s103_s23 = ssub.s32 %s515_s16, %s686_s20 }
   0xa   : > { %p368_p6 = scmp.ge.s32.totalorder %s519_s17, 1  ;;  %p105_p7 = scmp.eq.s32.totalorder %s103_s23, 0 }
   0xb   : > { %p596_p8 = por %p124_p5, %p123_p3  ;;  %p159_p9 = scmp.lt.s32.totalorder %s519_s17, 3 }
   0xc   : > { %s602_s25 = scalar_select %p105_p7, %s507_s14, %s107_s21  }
   0xd   : > { %p160_p10 = pnand %p368_p6, %p159_p9 }
   0xe   : > { %v196_v0 = vld [vmem:[%s675_s1] sm:$0xff] (!%p160_p10)  ;;  %v521_v1 = vmov (!%p160_p10), 0   ;;  %v522_v2 = vmov (!%p160_p10), 1   ;;  %v523_v4 = vmov (!%p160_p10), 2   ;;  %v524_v5 = vmov (!%p160_p10), 3   ;;  %p188_p11 = scmp.lt.s32.totalorder (!%p160_p10), %s511_s15, 1 }
   0xf   : > { %163 = sbr.rel (%p160_p10) target bundleno = 173 (0xad), region = 32  ;;  %437 = vset.pattern.permute.xlu0 (!%p160_p10), %v521_v1  ;;  %438 = vset.pattern.permute.xlu1 (!%p160_p10), %v522_v2  ;;  %v197_v3 = vld [vmem:[%s676_s2] sm:$0xff] (!%p160_p10)  ;;  %v203_v6 = vlaneseq (!%p160_p10)  ;;  %s183_s8 = sand.u32 (!%p160_p10), 1, %s503_s13  }
  0x10   : > { %200 = vperm.xlu0 (!%p160_p10), %437, %v196_v0   ;;  %215 = vperm.xlu1 (!%p160_p10), %438, %v196_v0   ;;  %s369_s9 = sshll.u32 (!%p160_p10), %s183_s8, 4  ;;  %s372_s18 = sshll.u32 (!%p160_p10), %s511_s15, 7 }
  0x11   : > { %v204_v7 = vshrl.u32 (!%p160_p10), %v203_v6, 7  ;;  %s185_s10 = scalar_lea.vmem (!%p160_p10), [#allocation2], %s369_s9  ;;  %s624_s23 = scalar_lea.hbm (!%p160_p10), %s677_s3, %s372_s18 }
  0x12   : > { %s286_s11 = sshll.u32 (!%p160_p10), %s185_s10, 4  ;;  %s525_s27 = smov (!%p160_p10), [#allocation2]   ;;  %s619_s11 = int_to_ptr.vmem [resolvable:$true] %s286_s11 }
  0x13   : > { %v205_v8 = vsub.s32 (!%p160_p10), 0, %v204_v7  ;;  %v247_v9 = vsub.s32 (!%p160_p10), 4, %v204_v7  ;;  %v220_v11 = vsub.s32 (!%p160_p10), 1, %v204_v7  ;;  %v253_v12 = vsub.s32 (!%p160_p10), 5, %v204_v7  ;;  %s441_s26 = scalar_lea.vmem (!%p160_p10), %s619_s11, 256  ;;  %s445_s28 = sshll.u32 (!%p160_p10), %s525_s27, 4  ;;  %s446_s28 = int_to_ptr.vmem [resolvable:$false] %s445_s28 }
  0x14   : > { %210 = vperm.xlu0 (!%p160_p10), %437, %v197_v3   ;;  %439 = vset.pattern.permute.xlu1 (!%p160_p10), %v523_v4  ;;  %v230_v13 = vsub.s32 (!%p160_p10), 2, %v204_v7  ;;  %v259_v14 = vsub.s32 (!%p160_p10), 6, %v204_v7  ;;  %v240_v23 = vsub.s32 (!%p160_p10), 3, %v204_v7  ;;  %v265_v24 = vsub.s32 (!%p160_p10), 7, %v204_v7  ;;  %p442_p12 = scmp.ne.s32.totalorder (!%p160_p10), %s619_s11, %s441_s26  ;;  %s447_s29 = scalar_lea.vmem (!%p160_p10), %s446_s28, 512 }
  0x15   : > { %225 = vperm.xlu1 (!%p160_p10), %439, %v196_v0   ;;  %p448_p1 = scmp.lt.s32.totalorder (!%p160_p10), %s619_s11, %s446_s28  ;;  %p449_p2 = scmp.lt.s32.totalorder (!%p160_p10), %s447_s29, %s441_s26 }
  0x16   : > { %s189_s30 = scalar_select %p188_p11, %s511_s15, 1 }
  0x17   : > { %s628_s15 = scalar_lea.sflag [#allocation3], %s183_s8  ;;  %p443_p13 = pnand %p442_p12, %p589_p4 }
  0x18   : > { %440 = vset.pattern.permute.xlu0 %v524_v5  ;;  %s370_s4 = sshll.u32 %s189_s30, 3  ;;  %p450_p3 = por %p449_p2, %p448_p1 }
  0x19   : > { %235 = vperm.xlu0 %440, %v196_v0   ;;  %s193_s7 = scalar_lea.vmem %s674_s0, %s370_s4  ;;  %p444_p0 = pneg %p443_p13 }
  0x1a   : > { %v195_v10 = vld [vmem:[%s193_s7] sm:$0xff] }
  0x1b   : > { %v206_v15 = vrot.slane %v195_v10, %v205_v8  ;;  %v248_v16 = vrot.slane %v195_v10, %v247_v9  ;;  %v221_v19 = vrot.slane %v195_v10, %v220_v11  ;;  %v254_v20 = vrot.slane %v195_v10, %v253_v12  ;;  %p451_p5 = pnand %p450_p3, %p444_p0 }
  0x1c   : > { %v231_v21 = vrot.slane %v195_v10, %v230_v13  ;;  %v260_v22 = vrot.slane %v195_v10, %v259_v14  ;;  %v241_v35 = vrot.slane %v195_v10, %v240_v23  ;;  %v266_v36 = vrot.slane %v195_v10, %v265_v24 }
  0x8f   : > { %v201_v17 = vpop.permute.xlu0 %200  ;;  %v216_v18 = vpop.permute.xlu1 %215 }
  0x90   : > { %v207_v25 = vmul.f32 %v206_v15, %v201_v17  ;;  %v249_v26 = vmul.f32 %v248_v16, %v201_v17  ;;  %v222_v28 = vmul.f32 %v221_v19, %v216_v18  ;;  %v255_v29 = vmul.f32 %v254_v20, %v216_v18 }
  0x93   : > { %v211_v27 = vpop.permute.xlu0 %210 }
  0x94   : > { %v213_v30 = vadd.f32 %v211_v27, %v207_v25  ;;  %v250_v31 = vadd.f32 %v249_v26, %v211_v27  ;;  %v226_v32 = vpop.permute.xlu1 %225 }
  0x95   : > { %v232_v33 = vmul.f32 %v231_v21, %v226_v32  ;;  %v261_v34 = vmul.f32 %v260_v22, %v226_v32 }
  0x96   : > { %v223_v37 = vadd.f32 %v222_v28, %v213_v30  ;;  %v256_v38 = vadd.f32 %v255_v29, %v250_v31 }
  0x98   : > { %v233_v39 = vadd.f32 %v232_v33, %v223_v37  ;;  %v262_v40 = vadd.f32 %v261_v34, %v256_v38  ;;  %v236_v41 = vpop.permute.xlu0 %235 }
  0x99   : > { %v242_v42 = vmul.f32 %v241_v35, %v236_v41  ;;  %v267_v43 = vmul.f32 %v266_v36, %v236_v41 }
  0x9b   : > { %v243_v44 = vadd.f32 %v242_v42, %v233_v39  ;;  %v268_v45 = vadd.f32 %v267_v43, %v262_v40 }
  0x9d   : > { %244 = vst [vmem:[%s185_s10] sm:$0xff] %v243_v44  ;;  %269 = vst [vmem:[%s185_s10 + $0x8] sm:$0xff] %v268_v45 }
  0x9e   : > { %454 = shalt.err (!%p451_p5)
}
  0x9f   : > { %s455_s30 = scalar_lea.hbm %s624_s23, 256  ;;  %s459_s6 = scalar_lea.hbm %s677_s3, 512 }
  0xa0   : > { %p456_p6 = scmp.ne.s32.totalorder %s624_s23, %s455_s30  ;;  %p460_p10 = scmp.lt.u32.totalorder %s624_s23, %s677_s3 }
  0xa1   : > { %p461_p11 = scmp.lt.u32.totalorder %s459_s6, %s455_s30  ;;  %p463_p13 = scmp.lt.u32.totalorder %s455_s30, %s624_s23 }
  0xa2   : > { %p457_p7 = pnand %p456_p6, %p589_p4 }
  0xa3   : > { %p462_p12 = por %p461_p11, %p460_p10 }
  0xa4   : > { %p458_p9 = pneg %p457_p7 }
  0xa5   : > { %p464_p0 = por %p463_p13, %p462_p12 }
  0xa7   : > { %p465_p1 = pnand %p464_p0, %p458_p9 }
  0xa9   : > { %468 = shalt.err (!%p465_p1)
}
  0xaa   : > { %s526_s9 = smov 128   ;;  %s527_s10 = smov 256  }
  0xab   : > { %s528_s18 = smov 8  }
  0xac   : > { %375 = dma.vmem_to_hbm [thread:$0]  (%p589_p4), %s619_s11, 256, %s624_s23, %s628_s15, %s526_s9, %s527_s10, %s528_s18  }
  0xad PF: > { %p381_p2 = scmp.ge.s32.totalorder %s519_s17, 2  ;;  %s301_s19 = sand.u32 1, %s499_s12  }
  0xae   : > { %s302_s21 = scalar_lea.sflag [#allocation3], %s301_s19 }
  0xaf   : > { %p378_p3 = pnand %p381_p2, %p596_p8 }
  0xb1   : > { %494 = dma.done.wait (!%p378_p3), %s302_s21, 256  }
  0xb2   : > { %496 = vsyncadd (!%p378_p3), %s302_s21, 4294967040  ;;  %s16_s17 = sadd.s32 1, %s519_s17   ;;  %s680_s12 = smov %s503_s13 }
  0xb3   : > { %p13_p5 = scmp.ge.s32.totalorder %s16_s17, 4   ;;  %s681_s13 = smov %s507_s14 }
  0xb4   : > { %s682_s14 = smov %s602_s25  ;;  %s683_s15 = smov %s515_s16 }
  0xb5   : > { %s684_s16 = smov %s686_s20  ;;  %15 = sbr.rel (!%p13_p5) target bundleno = 4 (0x4), region = 67 }
  0xbc   :  { %307 = vsyncpa [#allocation3], 1 }
  0xbd   :  { %309 = vsyncpa [#allocation3 + $0x1], 1 }

</bundles_post_ra>
